<compile_context>
chip_gen: v6e
topology: v6e:2x2x1
jax: 0.10.0
libtpu: 0.0.40
codegen_flags: <defaults>
</compile_context>

<pallas_src>
import functools

import jax
import jax.numpy as jnp
from jax import lax
from jax.experimental import pallas as pl
from jax.experimental.pallas import tpu as pltpu


def _sq_sum_dgrad_h(d):
    """Sum of squares of torch.gradient(d, dim=-2), no concatenation."""
    h = d.shape[-2]
    first = d[:, 1:2, :] - d[:, 0:1, :]
    last = d[:, h - 1:h, :] - d[:, h - 2:h - 1, :]
    s = jnp.sum(first * first) + jnp.sum(last * last)
    if h > 2:  # static shape -> Python-level branch
        mid = d[:, 2:, :] - d[:, :-2, :]
        s = s + 0.25 * jnp.sum(mid * mid)   # fold the 0.5 central-diff scale
    return s


def _sq_sum_dgrad_w(d):
    """Sum of squares of torch.gradient(d, dim=-1), no concatenation."""
    w = d.shape[-1]
    first = d[:, :, 1:2] - d[:, :, 0:1]
    last = d[:, :, w - 1:w] - d[:, :, w - 2:w - 1]
    s = jnp.sum(first * first) + jnp.sum(last * last)
    if w > 2:
        mid = d[:, :, 2:] - d[:, :, :-2]
        s = s + 0.25 * jnp.sum(mid * mid)
    return s


def _loss_kernel(pred_ref, target_ref, out_ref, *, alpha, tb, bc):
    p = pred_ref[...].astype(jnp.float32)   # (TB, H, W)
    t = target_ref[...].astype(jnp.float32)

    # gradient is linear: grad(p) - grad(t) == grad(p - t); compute diff once.
    d = p - t

    if bc % tb != 0:
        # Ragged tail: zero the slabs past the end of the real array so they
        # contribute nothing.  jnp.where is a select, so even NaN garbage in
        # the out-of-bounds padding is discarded safely.
        valid = bc - pl.program_id(0) * tb
        slab_idx = lax.broadcasted_iota(jnp.int32, (tb, 1, 1), 0)
        d = jnp.where(slab_idx < valid, d, 0.0)

    se = jnp.sum(d * d)                      # distance (MSE numerator) term
    se_y = _sq_sum_dgrad_h(d)                # gradient term along H
    se_x = _sq_sum_dgrad_w(d)                # gradient term along W
    total = se + alpha * (se_y + se_x)

    # Lane-dense, unmasked full-tile store of this block's partial sum;
    # the wrapper reads element [0, 0] of each block's tile.
    out_ref[...] = jnp.full((8, 128), total, dtype=jnp.float32)


def _vmem_capacity_bytes():
    """Physical VMEM of the local TPU generation; conservative fallback."""
    try:
        cap = getattr(pltpu.get_tpu_info(), "vmem_capacity_bytes", None)
        if cap:
            return int(cap)
    except Exception:
        pass
    return 64 * 1024 * 1024   # v7x-sized fallback (smallest current gen)


_TARGET_BLOCK_BYTES = 8 * 1024 * 1024   # per-input block target (4-8 MiB regime)


def distance_gradient_loss(pred, target, alpha=1.0, *, interpret=False):
    assert pred.shape == target.shape, "pred/target shapes must match"
    n, c, h, w = pred.shape
    assert h >= 2 and w >= 2, "torch.gradient needs at least 2 points per axis"

    bc = n * c
    p3 = pred.reshape(bc, h, w)
    t3 = target.reshape(bc, h, w)

    itemsize = jnp.dtype(pred.dtype).itemsize
    slab_in_bytes = h * w * itemsize
    slab_f32_bytes = h * w * 4
    # Per-slab VMEM working set: 2 inputs x 2 pipeline buffers in the input
    # dtype, plus ~4 block-sized f32 temporaries (d + sliced gradient diffs).
    slab_ws_bytes = 4 * slab_in_bytes + 4 * slab_f32_bytes

    vmem_budget = (3 * _vmem_capacity_bytes()) // 4      # generation aware

    tb = min(bc,
             max(1, _TARGET_BLOCK_BYTES // max(slab_in_bytes, 1)),
             max(1, vmem_budget // max(slab_ws_bytes, 1)))
    # Keep at least min(bc, 4) grid steps: v7x megacore sharding of the
    # "parallel" axis plus steps for the DMA pipeline to overlap.
    desired_blocks = min(bc, 4)
    tb = max(1, min(tb, bc // desired_blocks))

    num_blocks = (bc + tb - 1) // tb                     # ragged tail allowed

    working_set = tb * slab_ws_bytes
    vmem_limit = int(min(vmem_budget, max(32 * 1024 * 1024, 2 * working_set)))

    kernel = functools.partial(_loss_kernel, alpha=float(alpha), tb=tb, bc=bc)

    out = pl.pallas_call(
        kernel,
        out_shape=jax.ShapeDtypeStruct((num_blocks * 8, 128), jnp.float32),
        grid_spec=pltpu.PrefetchScalarGridSpec(
            num_scalar_prefetch=0,
            grid=(num_blocks,),
            in_specs=[
                # Default double-buffering; pipeline_mode=pl.Buffered(3) is a
                # cheap sweep if xprof shows exposed DMA at step boundaries.
                pl.BlockSpec((tb, h, w), lambda i: (i, 0, 0)),
                pl.BlockSpec((tb, h, w), lambda i: (i, 0, 0)),
            ],
            out_specs=pl.BlockSpec((8, 128), lambda i: (i, 0)),
        ),
        compiler_params=pltpu.CompilerParams(
            dimension_semantics=("parallel",),   # per-block outputs -> race-free
            vmem_limit_bytes=vmem_limit,
        ),
        interpret=interpret,
    )(p3, t3)

    partials = out[::8, 0]                   # one partial sum per grid block
    inv_count = 1.0 / float(n * c * h * w)   # same denominator for all terms
    return jnp.sum(partials) * inv_count


def _reference_loss(pred, target, alpha=1.0):
    """Pure-JAX reference reproducing the PyTorch module exactly."""
    dy_t, dx_t = jnp.gradient(target, axis=(-2, -1))
    dy_p, dx_p = jnp.gradient(pred, axis=(-2, -1))
    mse = lambda a, b: jnp.mean((a - b) ** 2)
    return mse(pred, target) + alpha * (mse(dy_p, dy_t) + mse(dx_p, dx_t))


if __name__ == "__main__":
    key = jax.random.PRNGKey(0)
    k1, k2, k3, k4 = jax.random.split(key, 4)
    alpha = 1.0

    # Primary check, compiled for the TPU backend.
    shape = (2, 4, 16, 16)  # N, C, H, W  ->  N*C = 8, TB = 2, 4 grid blocks
    pred = jax.random.normal(k1, shape, dtype=jnp.float32)
    target = jax.random.normal(k2, shape, dtype=jnp.float32)
    loss = jax.block_until_ready(distance_gradient_loss(pred, target, alpha=alpha))
    ref = _reference_loss(pred, target, alpha=alpha)
    assert jnp.allclose(loss, ref, rtol=1e-5, atol=1e-5), (loss, ref)

    # Ragged-tail masking check (N*C = 9 -> TB = 2, 5 blocks, last block has a
    # single valid slab).  Run in interpret mode: validates the masking
    # numerics of the rare ragged path without extra device compilation.
    shape2 = (3, 3, 16, 16)
    pred2 = jax.random.normal(k3, shape2, dtype=jnp.float32)
    target2 = jax.random.normal(k4, shape2, dtype=jnp.float32)
    loss2 = jax.block_until_ready(
        distance_gradient_loss(pred2, target2, alpha=alpha, interpret=True))
    ref2 = _reference_loss(pred2, target2, alpha=alpha)
    assert jnp.allclose(loss2, ref2, rtol=1e-5, atol=1e-5), (loss2, ref2)

    print("KERNEL_OK")
</pallas_src>

<mosaic_0001>
module attributes {stable_mosaic.version = 11 : i64} {
  func.func @_loss_kernel(%arg0: i32, %arg1: memref<2x16x16xf32, #tpu.memory_space<vmem>>, %arg2: memref<2x16x16xf32, #tpu.memory_space<vmem>>, %arg3: memref<8x128xf32, #tpu.memory_space<vmem>>) attributes {dimension_semantics = [#tpu.dimension_semantics<parallel>], iteration_bounds = array<i64: 4>, scalar_prefetch = 0 : i64, scratch_operands = 0 : i64, tpu.core_type = #tpu.core_type<tc>, window_params = [{transform_indices = @transform_0, window_bounds = array<i64: 2, 16, 16>}, {transform_indices = @transform_1, window_bounds = array<i64: 2, 16, 16>}, {transform_indices = @transform_2, window_bounds = array<i64: 8, 128>}]} {
    %c0 = arith.constant 0 : index
    %c0_0 = arith.constant 0 : index
    %c0_1 = arith.constant 0 : index
    %0 = vector.load %arg1[%c0, %c0_0, %c0_1] : memref<2x16x16xf32, #tpu.memory_space<vmem>>, vector<2x16x16xf32>
    %c0_2 = arith.constant 0 : index
    %c0_3 = arith.constant 0 : index
    %c0_4 = arith.constant 0 : index
    %1 = vector.load %arg2[%c0_2, %c0_3, %c0_4] : memref<2x16x16xf32, #tpu.memory_space<vmem>>, vector<2x16x16xf32>
    %2 = arith.subf %0, %1 : vector<2x16x16xf32>
    %3 = arith.mulf %2, %2 : vector<2x16x16xf32>
    %4 = vector.shape_cast %3 : vector<2x16x16xf32> to vector<1x2x16x16xf32>
    %cst = arith.constant dense<0.000000e+00> : vector<1xf32>
    %5 = vector.multi_reduction <add>, %4, %cst [1, 2, 3] : vector<1x2x16x16xf32> to vector<1xf32>
    %6 = vector.shape_cast %5 : vector<1xf32> to vector<1x1x1x1xf32>
    %7 = vector.extract %6[0, 0, 0, 0] : f32 from vector<1x1x1x1xf32>
    %8 = vector.extract_strided_slice %2 {offsets = [0, 1, 0], sizes = [2, 1, 16], strides = [1, 1, 1]} : vector<2x16x16xf32> to vector<2x1x16xf32>
    %9 = vector.extract_strided_slice %2 {offsets = [0, 0, 0], sizes = [2, 1, 16], strides = [1, 1, 1]} : vector<2x16x16xf32> to vector<2x1x16xf32>
    %10 = arith.subf %8, %9 : vector<2x1x16xf32>
    %11 = vector.extract_strided_slice %2 {offsets = [0, 15, 0], sizes = [2, 1, 16], strides = [1, 1, 1]} : vector<2x16x16xf32> to vector<2x1x16xf32>
    %12 = vector.extract_strided_slice %2 {offsets = [0, 14, 0], sizes = [2, 1, 16], strides = [1, 1, 1]} : vector<2x16x16xf32> to vector<2x1x16xf32>
    %13 = arith.subf %11, %12 : vector<2x1x16xf32>
    %14 = arith.mulf %10, %10 : vector<2x1x16xf32>
    %15 = vector.shape_cast %14 : vector<2x1x16xf32> to vector<1x2x1x16xf32>
    %cst_5 = arith.constant dense<0.000000e+00> : vector<1xf32>
    %16 = vector.multi_reduction <add>, %15, %cst_5 [1, 2, 3] : vector<1x2x1x16xf32> to vector<1xf32>
    %17 = vector.shape_cast %16 : vector<1xf32> to vector<1x1x1x1xf32>
    %18 = vector.extract %17[0, 0, 0, 0] : f32 from vector<1x1x1x1xf32>
    %19 = arith.mulf %13, %13 : vector<2x1x16xf32>
    %20 = vector.shape_cast %19 : vector<2x1x16xf32> to vector<1x2x1x16xf32>
    %cst_6 = arith.constant dense<0.000000e+00> : vector<1xf32>
    %21 = vector.multi_reduction <add>, %20, %cst_6 [1, 2, 3] : vector<1x2x1x16xf32> to vector<1xf32>
    %22 = vector.shape_cast %21 : vector<1xf32> to vector<1x1x1x1xf32>
    %23 = vector.extract %22[0, 0, 0, 0] : f32 from vector<1x1x1x1xf32>
    %24 = arith.addf %18, %23 : f32
    %25 = vector.extract_strided_slice %2 {offsets = [0, 2, 0], sizes = [2, 14, 16], strides = [1, 1, 1]} : vector<2x16x16xf32> to vector<2x14x16xf32>
    %26 = vector.extract_strided_slice %2 {offsets = [0, 0, 0], sizes = [2, 14, 16], strides = [1, 1, 1]} : vector<2x16x16xf32> to vector<2x14x16xf32>
    %27 = arith.subf %25, %26 : vector<2x14x16xf32>
    %28 = arith.mulf %27, %27 : vector<2x14x16xf32>
    %29 = vector.shape_cast %28 : vector<2x14x16xf32> to vector<1x2x14x16xf32>
    %cst_7 = arith.constant dense<0.000000e+00> : vector<1xf32>
    %30 = vector.multi_reduction <add>, %29, %cst_7 [1, 2, 3] : vector<1x2x14x16xf32> to vector<1xf32>
    %31 = vector.shape_cast %30 : vector<1xf32> to vector<1x1x1x1xf32>
    %32 = vector.extract %31[0, 0, 0, 0] : f32 from vector<1x1x1x1xf32>
    %cst_8 = arith.constant 2.500000e-01 : f32
    %33 = arith.mulf %cst_8, %32 : f32
    %34 = arith.addf %24, %33 : f32
    %35 = vector.extract_strided_slice %2 {offsets = [0, 0, 1], sizes = [2, 16, 1], strides = [1, 1, 1]} : vector<2x16x16xf32> to vector<2x16x1xf32>
    %36 = vector.extract_strided_slice %2 {offsets = [0, 0, 0], sizes = [2, 16, 1], strides = [1, 1, 1]} : vector<2x16x16xf32> to vector<2x16x1xf32>
    %37 = arith.subf %35, %36 : vector<2x16x1xf32>
    %38 = vector.extract_strided_slice %2 {offsets = [0, 0, 15], sizes = [2, 16, 1], strides = [1, 1, 1]} : vector<2x16x16xf32> to vector<2x16x1xf32>
    %39 = vector.extract_strided_slice %2 {offsets = [0, 0, 14], sizes = [2, 16, 1], strides = [1, 1, 1]} : vector<2x16x16xf32> to vector<2x16x1xf32>
    %40 = arith.subf %38, %39 : vector<2x16x1xf32>
    %41 = arith.mulf %37, %37 : vector<2x16x1xf32>
    %42 = vector.shape_cast %41 : vector<2x16x1xf32> to vector<1x2x16x1xf32>
    %cst_9 = arith.constant dense<0.000000e+00> : vector<1xf32>
    %43 = vector.multi_reduction <add>, %42, %cst_9 [1, 2, 3] : vector<1x2x16x1xf32> to vector<1xf32>
    %44 = vector.shape_cast %43 : vector<1xf32> to vector<1x1x1x1xf32>
    %45 = vector.extract %44[0, 0, 0, 0] : f32 from vector<1x1x1x1xf32>
    %46 = arith.mulf %40, %40 : vector<2x16x1xf32>
    %47 = vector.shape_cast %46 : vector<2x16x1xf32> to vector<1x2x16x1xf32>
    %cst_10 = arith.constant dense<0.000000e+00> : vector<1xf32>
    %48 = vector.multi_reduction <add>, %47, %cst_10 [1, 2, 3] : vector<1x2x16x1xf32> to vector<1xf32>
    %49 = vector.shape_cast %48 : vector<1xf32> to vector<1x1x1x1xf32>
    %50 = vector.extract %49[0, 0, 0, 0] : f32 from vector<1x1x1x1xf32>
    %51 = arith.addf %45, %50 : f32
    %52 = vector.extract_strided_slice %2 {offsets = [0, 0, 2], sizes = [2, 16, 14], strides = [1, 1, 1]} : vector<2x16x16xf32> to vector<2x16x14xf32>
    %53 = vector.extract_strided_slice %2 {offsets = [0, 0, 0], sizes = [2, 16, 14], strides = [1, 1, 1]} : vector<2x16x16xf32> to vector<2x16x14xf32>
    %54 = arith.subf %52, %53 : vector<2x16x14xf32>
    %55 = arith.mulf %54, %54 : vector<2x16x14xf32>
    %56 = vector.shape_cast %55 : vector<2x16x14xf32> to vector<1x2x16x14xf32>
    %cst_11 = arith.constant dense<0.000000e+00> : vector<1xf32>
    %57 = vector.multi_reduction <add>, %56, %cst_11 [1, 2, 3] : vector<1x2x16x14xf32> to vector<1xf32>
    %58 = vector.shape_cast %57 : vector<1xf32> to vector<1x1x1x1xf32>
    %59 = vector.extract %58[0, 0, 0, 0] : f32 from vector<1x1x1x1xf32>
    %cst_12 = arith.constant 2.500000e-01 : f32
    %60 = arith.mulf %cst_12, %59 : f32
    %61 = arith.addf %51, %60 : f32
    %62 = arith.addf %34, %61 : f32
    %cst_13 = arith.constant 1.000000e+00 : f32
    %63 = arith.mulf %cst_13, %62 : f32
    %64 = arith.addf %7, %63 : f32
    %65 = vector.broadcast %64 : f32 to vector<8x128xf32>
    %c0_14 = arith.constant 0 : index
    %c0_15 = arith.constant 0 : index
    %66 = vector.load %arg3[%c0_14, %c0_15] : memref<8x128xf32, #tpu.memory_space<vmem>>, vector<8x128xf32>
    tpu.vector_store %arg3[%c0_14, %c0_15], %65 {strides = array<i32>} : memref<8x128xf32, #tpu.memory_space<vmem>>, vector<8x128xf32>,
    return
  }
  func.func @transform_0(%arg0: i32) -> (i32, i32, i32) {
    %c0_i32 = arith.constant 0 : i32
    %c0_i32_0 = arith.constant 0 : i32
    %c0_i32_1 = arith.constant 0 : i32
    return %arg0, %c0_i32, %c0_i32_0 : i32, i32, i32
  }
  func.func @transform_1(%arg0: i32) -> (i32, i32, i32) {
    %c0_i32 = arith.constant 0 : i32
    %c0_i32_0 = arith.constant 0 : i32
    %c0_i32_1 = arith.constant 0 : i32
    return %arg0, %c0_i32, %c0_i32_0 : i32, i32, i32
  }
  func.func @transform_2(%arg0: i32) -> (i32, i32) {
    %c0_i32 = arith.constant 0 : i32
    %c0_i32_0 = arith.constant 0 : i32
    return %arg0, %c0_i32 : i32, i32
  }
}

</mosaic_0001>

<bundles_post_ra>
// kernel: tpu_custom_call.1
= control target key start
LH: loop header
LB: loop body
LE: loop exit
PB: predicated region body
PF: predicated region fallthrough
CT: control target
= control target key end

     0   :  { %s1131_s0 = inlined_call_operand.hbm [shape: f32[8,16,16], index: 0, kind: input, shape index: {}]   ;;  %s1132_s1 = inlined_call_operand.hbm [shape: f32[8,16,16], index: 1, kind: input, shape index: {}]   ;;  %s1133_s2 = inlined_call_operand.hbm [shape: f32[32,128], index: 2, kind: output, shape index: {}]  }
   0x1   :  { %1137 = sst [smem:[#allocation13_spill]] %s1131_s0 }
   0x2   :  { %1138 = sst [smem:[#allocation14_spill]] %s1132_s1 }
   0x3   :  { %7 = vsyncpa [#allocation3], 0 }
   0x4   :  { %9 = vsyncpa [#allocation3 + $0x1], 0 }
   0x5   :  { %10 = vsyncpa [#allocation6], 0 }
   0x6   :  { %12 = vsyncpa [#allocation6 + $0x1], 0 }
   0x7   :  { %13 = vsyncpa [#allocation4], 0 }
   0x8   :  { %15 = vsyncpa [#allocation4 + $0x1], 0  ;;  %s844_s9 = smov 0   ;;  %s846_s10 = smov 0  }
   0x9   :  { %s848_s11 = smov 0   ;;  %s850_s12 = smov 0  }
   0xa LB: > { %1139 = sst [smem:[#allocation11_spill]] %s813_s11  ;;  %s865_s13 = sadd.s32 4294967295, %s817_s12   ;;  %s817_s12 = sphi %s850_s12, %s1156_s12   ;;  %s813_s11 = sphi %s848_s11, %s1153_s11   ;;  %s809_s10 = sphi %s846_s10, %s1155_s10   ;;  %s805_s9 = sphi %s844_s9, %s1154_s9  }
   0xb   : > { %s598_s14 = sadd.s32 4294967294, %s817_s12   ;;  %s869_s15 = sadd.s32 1, %s817_s12  }
   0xc   : > { %s28_s16 = sadd.s32 1, %s813_s11  ;;  %s25_s17 = ssub.s32 %s817_s12, %s869_s15 }
   0xd   : > { %p35_p0 = scmp.ne.s32.totalorder %s813_s11, %s809_s10  ;;  %p26_p1 = scmp.eq.s32.totalorder %s25_s17, 0 }
   0xe   : > { %p36_p2 = scmp.eq.s32.totalorder %s817_s12, 0  ;;  %p41_p3 = scmp.ne.s32.totalorder %s809_s10, %s805_s9 }
   0xf   : > { %p42_p4 = scmp.eq.s32.totalorder %s865_s13, 0  ;;  %p91_p7 = scmp.eq.s32.totalorder %s865_s13, 3 }
  0x10   : > { %s881_s18 = scalar_select %p26_p1, %s813_s11, %s28_s16  }
  0x11   : > { %p883_p5 = por %p36_p2, %p35_p0  ;;  %p887_p6 = por %p42_p4, %p41_p3 }
  0x12   : > { %1140 = sst [smem:[#allocation12_spill]] %s881_s18  ;;  %p97_p8 = scmp.eq.s32.totalorder %s598_s14, 3 }
  0x13   : > { %s1142_s20 = scalar_select %p887_p6, 1, 0 }
  0x14   : > { %p652_p9 = scmp.lt.s32.totalorder %s817_s12, 4  ;;  %p893_p10 = por %p91_p7, %p35_p0 }
  0x15   : > { %p897_p11 = por %p97_p8, %p41_p3  ;;  %s902_s23 = sand.u32 1, %s813_s11  }
  0x16   : > { %s1143_s21 = scalar_select %p893_p10, 1, 0 }
  0x17   : > { %s1144_s22 = scalar_select %p897_p11, 1, 0 }
  0x18   : > { %s618_s24 = sshll.u32 %s817_s12, 9  ;;  %s601_s25 = sshll.u32 %s902_s23, 5 }
  0x19   : > { %s1145_s0 = sld [smem:[#allocation13_spill]]  ;;  %s121_s29 = scalar_lea.vmem [#allocation2], %s601_s25 }
  0x1a   : > { %s129_s30 = sshll.u32 %s121_s29, 4  ;;  %p917_p12 = pnand %p652_p9, %p883_p5  ;;  %s921_s30 = int_to_ptr.vmem [resolvable:$true] %s129_s30 }
  0x1b   : > { %s118_s4 = scalar_lea.sflag [#allocation3], %s902_s23 }
  0x1c   : > { %p695_p0 = pneg %p917_p12 }
  0x1f   : > { %s911_s28 = scalar_lea.hbm %s1145_s0, %s618_s24  ;;  %s698_s8 = scalar_lea.hbm %s1145_s0, 2048 }
  0x20   : > { %s693_s5 = scalar_lea.hbm %s911_s28, 512  ;;  %p699_p3 = scmp.lt.s32.totalorder %s911_s28, %s1145_s0 }
  0x21   : > { %p694_p13 = scmp.ne.s32.totalorder %s911_s28, %s693_s5  ;;  %p700_p4 = scmp.lt.s32.totalorder %s698_s8, %s693_s5 }
  0x23   : > { %p696_p1 = pnand %p695_p0, %p694_p13  ;;  %p701_p5 = por %p700_p4, %p699_p3 }
  0x25   : > { %p697_p2 = pneg %p696_p1 }
  0x27   : > { %p702_p7 = pnand %p701_p5, %p697_p2 }
  0x29   : > { %705 = shalt.err (!%p702_p7)
}
  0x2a   : > { %s706_s17 = scalar_lea.vmem %s921_s30, 512  ;;  %s819_s19 = smov [#allocation2]  }
  0x2b   : > { %p707_p8 = scmp.ne.s32.totalorder %s921_s30, %s706_s17  ;;  %s711_s26 = sshll.u32 %s819_s19, 4  ;;  %s712_s26 = int_to_ptr.vmem [resolvable:$false] %s711_s26 }
  0x2c   : > { %s713_s27 = scalar_lea.vmem %s712_s26, 1024  ;;  %p714_p1 = scmp.lt.s32.totalorder %s921_s30, %s712_s26 }
  0x2d   : > { %p709_p9 = pnand %p707_p8, %p695_p0  ;;  %p715_p11 = scmp.lt.s32.totalorder %s713_s27, %s706_s17 }
  0x2f   : > { %p710_p13 = pneg %p709_p9  ;;  %p716_p10 = por %p715_p11, %p714_p1 }
  0x31   : > { %p717_p3 = pnand %p716_p10, %p710_p13 }
  0x33   : > { %720 = shalt.err (!%p717_p3)
}
  0x34   : > { %s820_s29 = smov 128   ;;  %s821_s5 = smov 8  }
  0x35   : > { %644 = dma.hbm_to_vmem [thread:$0]  (!%p917_p12), %s911_s28, 512, %s921_s30, %s118_s4, %s820_s29, %s820_s29, %s821_s5  }
  0x36   : > { %p609_p10 = scmp.ge.s32.totalorder %s817_s12, 1  ;;  %p159_p11 = scmp.lt.s32.totalorder %s817_s12, 5 }
  0x37   : > { %s1148_s1 = sld [smem:[#allocation14_spill]]  ;;  %s143_s16 = scalar_lea.vmem [#allocation5], %s601_s25 }
  0x38   : > { %p955_p2 = pnand %p609_p10, %p159_p11  ;;  %s151_s17 = sshll.u32 %s143_s16, 4  ;;  %s968_s17 = int_to_ptr.vmem [resolvable:$true] %s151_s17 }
  0x39   : > { %s140_s28 = scalar_lea.sflag [#allocation6], %s902_s23 }
  0x3d   : > { %s964_s14 = scalar_lea.hbm %s1148_s1, %s618_s24  ;;  %s726_s24 = scalar_lea.hbm %s1148_s1, 2048 }
  0x3e   : > { %s721_s30 = scalar_lea.hbm %s964_s14, 512  ;;  %p727_p8 = scmp.lt.s32.totalorder %s964_s14, %s1148_s1 }
  0x3f   : > { %p722_p4 = scmp.ne.s32.totalorder %s964_s14, %s721_s30  ;;  %p728_p9 = scmp.lt.s32.totalorder %s726_s24, %s721_s30 }
  0x41   : > { %p724_p5 = pnand %p722_p4, %p695_p0  ;;  %p729_p13 = por %p728_p9, %p727_p8 }
  0x43   : > { %p725_p7 = pneg %p724_p5 }
  0x45   : > { %p730_p1 = pnand %p729_p13, %p725_p7 }
  0x47   : > { %733 = shalt.err (!%p730_p1)
}
  0x48   : > { %s734_s23 = scalar_lea.vmem %s968_s17, 512  ;;  %s822_s25 = smov [#allocation5]  }
  0x49   : > { %p735_p3 = scmp.ne.s32.totalorder %s968_s17, %s734_s23  ;;  %s739_s7 = sshll.u32 %s822_s25, 4  ;;  %s740_s7 = int_to_ptr.vmem [resolvable:$false] %s739_s7 }
  0x4a   : > { %s741_s8 = scalar_lea.vmem %s740_s7, 1024  ;;  %p742_p4 = scmp.lt.s32.totalorder %s968_s17, %s740_s7 }
  0x4b   : > { %p737_p10 = pnand %p735_p3, %p695_p0  ;;  %p743_p5 = scmp.lt.s32.totalorder %s741_s8, %s734_s23 }
  0x4d   : > { %p738_p11 = pneg %p737_p10  ;;  %p744_p6 = por %p743_p5, %p742_p4 }
  0x4f   : > { %p745_p8 = pnand %p744_p6, %p738_p11 }
  0x51   : > { %748 = shalt.err (!%p745_p8)
}
  0x52   : > { %647 = dma.hbm_to_vmem [thread:$0]  (!%p917_p12), %s964_s14, 512, %s968_s17, %s140_s28, %s820_s29, %s820_s29, %s821_s5  }
  0x53   : > { %163 = sbr.rel (%p955_p2) target bundleno = 578 (0x242), region = 28  ;;  %s999_s16 = sand.u32 (!%p955_p2), 1, %s809_s10  }
  0x54   : > { %s610_s30 = sshll.u32 (!%p955_p2), %s999_s16, 5  ;;  %s166_s4 = scalar_lea.sflag (!%p955_p2), [#allocation3], %s999_s16 }
  0x55   : > { %s169_s19 = scalar_lea.vmem (!%p955_p2), [#allocation2], %s610_s30  ;;  %p1149_p6 = scmp.ne.s32.totalorder (!%p955_p2), %s1142_s20, 0 }
  0x58   : > { %792 = dma.done.wait (%p1149_p6), %s166_s4, 512  }
  0x59   : > { %794 = vsyncadd (%p1149_p6), %s166_s4, 4294966784  ;;  %s175_s3 = scalar_lea.sflag [#allocation6], %s999_s16  ;;  %s178_s29 = scalar_lea.vmem [#allocation5], %s610_s30 }
  0x5a   : > { %796 = dma.done.wait (%p1149_p6), %s175_s3, 512  }
  0x5b   : > { %798 = vsyncadd (%p1149_p6), %s175_s3, 4294966784  ;;  %v206_v0 = vld [vmem:[%s169_s19] sm:$0xff]  ;;  %v207_v2 = vld [vmem:[%s169_s19 + $0x8] sm:$0xff]  ;;  %s823_s5 = smov 1   ;;  %s824_s6 = smov 2   ;;  %vm297_vm0 = vcmask 1041408  }
  0x5c   : > { %v210_v1 = vld [vmem:[%s178_s29] sm:$0xff]  ;;  %v211_v4 = vld [vmem:[%s178_s29 + $0x8] sm:$0xff]  ;;  %v208_v6 = vld [vmem:[%s169_s19 + $0x10] sm:$0xff]  ;;  %s825_s20 = smov 127   ;;  %s826_s14 = smov 113   ;;  %vm222_vm1 = vcmask 130048  }
  0x5d   : > { %v1012_v3 = vsub.f32 %v206_v0, %v210_v1  ;;  %v1015_v5 = vsub.f32 %v207_v2, %v211_v4  ;;  %v212_v7 = vld [vmem:[%s178_s29 + $0x10] sm:$0xff]  ;;  %v209_v9 = vld [vmem:[%s169_s19 + $0x18] sm:$0xff]  ;;  %s827_s17 = smov 126   ;;  %vm320_vm2 = vcmask 1045504   ;;  %vm332_vm3 = vcmask 128000   ;;  %s612_s30 = sshll.u32 %s999_s16, 3 }
  0x5e   : > { %v1020_v8 = vsub.f32 %v208_v6, %v212_v7  ;;  %v213_v10 = vld [vmem:[%s178_s29 + $0x18] sm:$0xff]  ;;  %vm263_vm4 = vcmask 122880   ;;  %vm386_vm5 = vcmask 7168   ;;  %vm468_vm6 = vcmask 113664   ;;  %p1150_p0 = scmp.ne.s32.totalorder %s1143_s21, 0 }
  0x5f   : > { %350 = vrot.lane.b32.xlu0 %v1012_v3, %s823_s5  ;;  %432 = vrot.lane.b32.xlu1 %v1012_v3, %s824_s6  ;;  %v1024_v11 = vsub.f32 %v209_v9, %v213_v10  ;;  %v298_v36 = vrot.slane %v1012_v3, 6  ;;  %v299_v37 = vrot.slane %v1015_v5, 6  ;;  %v218_v44 = vmul.f32 %v1012_v3, %v1012_v3 }
  0x60   : > { %v301_v39 = vrot.slane %v1020_v8, 6  ;;  %v219_v45 = vmul.f32 %v1015_v5, %v1015_v5  ;;  %v249_v46 = vrot.slane %v1015_v5, 7  ;;  %v220_v52 = vmul.f32 %v1020_v8, %v1020_v8 }
  0x61   : > { %v300_v38 = vsel %vm297_vm0, %v298_v36, %v299_v37  ;;  %v302_v40 = vrot.slane %v1024_v11, 6  ;;  %v308_v41 = vsub.f32 %v1012_v3, %v298_v36  ;;  %v250_v47 = vrot.slane %v1024_v11, 7 }
  0x62   : > { %v309_v42 = vsub.f32 %v1015_v5, %v300_v38  ;;  %v310_v48 = vsub.f32 %v1020_v8, %v301_v39  ;;  %v223_v53 = vsel %vm222_vm1, %v218_v44, 0.0  ;;  %v224_v54 = vsel %vm222_vm1, %v219_v45, 0.0 }
  0x63   : > { %352 = vrot.lane.b32.xlu0 %v1015_v5, %s823_s5  ;;  %434 = vrot.lane.b32.xlu1 %v1015_v5, %s824_s6  ;;  %v303_v43 = vsel %vm297_vm0, %v301_v39, %v302_v40  ;;  %v312_v50 = vmul.f32 %v308_v41, %v308_v41  ;;  %v253_v55 = vsub.f32 %v1015_v5, %v249_v46  ;;  %v241_v57 = vrot.slane %v1012_v3, 7 }
  0x64   : > { %v311_v49 = vsub.f32 %v1024_v11, %v303_v43  ;;  %v313_v51 = vmul.f32 %v309_v42, %v309_v42  ;;  %v254_v56 = vsub.f32 %v1024_v11, %v250_v47  ;;  %v242_v58 = vrot.slane %v1020_v8, 7 }
  0x65   : > { %v314_v59 = vmul.f32 %v310_v48, %v310_v48  ;;  %v321_v61 = vrot.slane %v312_v50, 2  ;;  %v221_v63 = vmul.f32 %v1024_v11, %v1024_v11  ;;  %v225_v0 = vadd.f32 %v224_v54, %v223_v53 }
  0x66   : > { %v315_v60 = vmul.f32 %v311_v49, %v311_v49  ;;  %v322_v62 = vrot.slane %v313_v51, 2  ;;  %v226_v1 = vsel %vm222_vm1, %v220_v52, 0.0  ;;  %v276_v2 = vmul.f32 %v253_v55, %v253_v55 }
  0x67   : > { %354 = vrot.lane.b32.xlu0 %v1020_v8, %s823_s5  ;;  %436 = vrot.lane.b32.xlu1 %v1020_v8, %s824_s6  ;;  %v277_v4 = vmul.f32 %v254_v56, %v254_v56  ;;  %v246_v6 = vsub.f32 %v1020_v8, %v242_v58  ;;  %v324_v9 = vrot.slane %v314_v59, 2 }
  0x68   : > { %v323_v7 = vsel %vm320_vm2, %v321_v61, %v322_v62  ;;  %v325_v10 = vrot.slane %v315_v60, 2 }
  0x6b   : > { %356 = vrot.lane.b32.xlu0 %v1024_v11, %s823_s5  ;;  %438 = vrot.lane.b32.xlu1 %v1024_v11, %s824_s6  ;;  %s614_s6 = sshll.u32 %s865_s13, 7 }
  0x6c   : > { %s1095_s11 = scalar_lea.hbm %s1133_s2, %s614_s6 }
  0xd1   : > { %v351_v12 = vpop.permute.xlu0 %350  ;;  %v433_v13 = vpop.permute.xlu1 %432 }
  0xd2   : > { %v362_v14 = vsub.f32 %v1012_v3, %v351_v12  ;;  %v444_v19 = vsub.f32 %v1012_v3, %v433_v13  ;;  %v227_v12 = vadd.f32 %v226_v1, %v225_v0  ;;  %v228_v13 = vsel %vm222_vm1, %v221_v63, 0.0 }
  0xd4   : > { %v366_v15 = vmul.f32 %v362_v14, %v362_v14  ;;  %v448_v22 = vmul.f32 %v444_v19, %v444_v19  ;;  %v280_v14 = vrot.slane %v276_v2, 7 }
  0xd5   : > { %v353_v16 = vpop.permute.xlu0 %352  ;;  %v435_v17 = vpop.permute.xlu1 %434 }
  0xd6   : > { %v363_v18 = vsub.f32 %v1015_v5, %v353_v16  ;;  %374 = vrot.lane.b32.xlu0 %v366_v15, %s825_s20  ;;  %v445_v23 = vsub.f32 %v1015_v5, %v435_v17  ;;  %v245_v5 = vsub.f32 %v1012_v3, %v241_v57  ;;  %v333_v16 = vsel %vm332_vm3, %v322_v62, 0.0 }
  0xd7   : > { %v326_v3 = vsel %vm320_vm2, %v324_v9, %v325_v10 }
  0xd8   : > { %v367_v20 = vmul.f32 %v363_v18, %v363_v18  ;;  %v449_v26 = vmul.f32 %v445_v23, %v445_v23  ;;  %v255_v17 = vmul.f32 %v245_v5, %v245_v5  ;;  %v256_v18 = vmul.f32 %v246_v6, %v246_v6 }
  0xd9   : > { %v355_v21 = vpop.permute.xlu0 %354  ;;  %v437_v25 = vpop.permute.xlu1 %436 }
  0xda   : > { %403 = vrot.lane.b32.xlu0 %v366_v15, %s826_s14  ;;  %376 = vrot.lane.b32.xlu1 %v367_v20, %s825_s20  ;;  %v364_v24 = vsub.f32 %v1020_v8, %v355_v21  ;;  %v446_v28 = vsub.f32 %v1020_v8, %v437_v25  ;;  %v281_v15 = vrot.slane %v277_v4, 7  ;;  %v229_v8 = vadd.f32 %v228_v13, %v227_v12 }
  0xdb   : > { %v259_v23 = vrot.slane %v255_v17, 1 }
  0xdc   : > { %v368_v27 = vmul.f32 %v364_v24, %v364_v24  ;;  %v450_v30 = vmul.f32 %v446_v28, %v446_v28  ;;  %v285_v21 = vsel %vm263_vm4, %v281_v15, 0.0  ;;  %v260_v24 = vrot.slane %v256_v18, 1 }
  0xdd   : > { %v357_v29 = vpop.permute.xlu0 %356  ;;  %v439_v32 = vpop.permute.xlu1 %438  ;;  %v264_v28 = vsel %vm263_vm4, %v259_v23, 0.0 }
  0xde   : > { %456 = vrot.lane.b32.xlu0 %v448_v22, %s827_s17  ;;  %405 = vrot.lane.b32.xlu1 %v367_v20, %s826_s14  ;;  %v365_v31 = vsub.f32 %v1024_v11, %v357_v29  ;;  %v447_v34 = vsub.f32 %v1024_v11, %v439_v32  ;;  %v331_v11 = vsel %vm222_vm1, %v323_v7, 0.0  ;;  %v284_v20 = vsel %vm263_vm4, %v280_v14, 0.0 }
  0xdf   : > { %v334_v19 = vadd.f32 %v333_v16, %v331_v11  ;;  %v335_v22 = vsel %vm222_vm1, %v326_v3, 0.0  ;;  %v286_v25 = vadd.f32 %v285_v21, %v284_v20  ;;  %v265_v29 = vsel %vm263_vm4, %v260_v24, 0.0 }
  0xe0   : > { %v369_v33 = vmul.f32 %v365_v31, %v365_v31  ;;  %v451_v35 = vmul.f32 %v447_v34, %v447_v34  ;;  %v266_v31 = vadd.f32 %v265_v29, %v264_v28 }
  0xe2   : > { %458 = vrot.lane.b32.xlu1 %v449_v26, %s827_s17  ;;  %378 = vrot.lane.b32.xlu0 %v368_v27, %s825_s20  ;;  %v336_v26 = vadd.f32 %v335_v22, %v334_v19 }
  0xe6   : > { %407 = vrot.lane.b32.xlu1 %v368_v27, %s826_s14  ;;  %460 = vrot.lane.b32.xlu0 %v450_v30, %s827_s17  ;;  %v337_v27 = vsel %vm332_vm3, %v325_v10, 0.0 }
  0xe7   : > { %v338_v30 = vadd.f32 %v337_v27, %v336_v26 }
  0xea   : > { %409 = vrot.lane.b32.xlu0 %v369_v33, %s826_s14  ;;  %380 = vrot.lane.b32.xlu1 %v369_v33, %s825_s20  ;;  %s203_s14 = scalar_lea.vmem [#allocation7], %s612_s30 }
  0xee   : > { %462 = vrot.lane.b32.xlu1 %v451_v35, %s827_s17  ;;  %s505_s17 = sshll.u32 %s203_s14, 4  ;;  %s506_s17 = int_to_ptr.vmem [resolvable:$true] %s505_s17 }
 0x109   : > { %230 = vadd.xlane.f32.xlu0 %v229_v8 }
 0x10d   : > { %287 = vadd.xlane.f32.xlu0 %v286_v25 }
 0x111   : > { %339 = vadd.xlane.f32.xlu0 %v338_v30 }
 0x112   : > { %267 = vadd.xlane.f32.xlu1 %v266_v31 }
 0x148   : > { %v375_v32 = vpop.permute.xlu0 %374 }
 0x149   : > { %v387_v43 = vsel %vm386_vm5, %v375_v32, 0.0 }
 0x14c   : > { %v377_v33 = vpop.permute.xlu1 %376  ;;  %v404_v34 = vpop.permute.xlu0 %403 }
 0x14d   : > { %v388_v39 = vsel %vm386_vm5, %v377_v33, 0.0  ;;  %v415_v44 = vsel %vm386_vm5, %v404_v34, 0.0 }
 0x14e   : > { %v389_v47 = vadd.f32 %v388_v39, %v387_v43 }
 0x150   : > { %v406_v35 = vpop.permute.xlu1 %405  ;;  %v457_v36 = vpop.permute.xlu0 %456 }
 0x151   : > { %v416_v40 = vsel %vm386_vm5, %v406_v35, 0.0  ;;  %v469_v54 = vsel %vm468_vm6, %v457_v36, 0.0 }
 0x152   : > { %v417_v48 = vadd.f32 %v416_v40, %v415_v44 }
 0x154   : > { %v459_v37 = vpop.permute.xlu1 %458  ;;  %v379_v38 = vpop.permute.xlu0 %378 }
 0x155   : > { %v390_v45 = vsel %vm386_vm5, %v379_v38, 0.0  ;;  %v470_v49 = vsel %vm468_vm6, %v459_v37, 0.0 }
 0x156   : > { %v391_v50 = vadd.f32 %v390_v45, %v389_v47  ;;  %v471_v58 = vadd.f32 %v470_v49, %v469_v54 }
 0x158   : > { %v408_v41 = vpop.permute.xlu1 %407  ;;  %v461_v42 = vpop.permute.xlu0 %460 }
 0x159   : > { %v418_v46 = vsel %vm386_vm5, %v408_v41, 0.0  ;;  %v472_v55 = vsel %vm468_vm6, %v461_v42, 0.0 }
 0x15a   : > { %v419_v51 = vadd.f32 %v418_v46, %v417_v48  ;;  %v473_v61 = vadd.f32 %v472_v55, %v471_v58 }
 0x15c   : > { %v381_v52 = vpop.permute.xlu1 %380  ;;  %v410_v53 = vpop.permute.xlu0 %409 }
 0x15d   : > { %v392_v56 = vsel %vm386_vm5, %v381_v52, 0.0  ;;  %v420_v57 = vsel %vm386_vm5, %v410_v53, 0.0 }
 0x15e   : > { %v393_v59 = vadd.f32 %v392_v56, %v391_v50  ;;  %v421_v60 = vadd.f32 %v420_v57, %v419_v51 }
 0x160   : > { %v463_v62 = vpop.permute.xlu1 %462  ;;  %394 = vadd.xlane.f32.xlu1 %v393_v59  ;;  %422 = vadd.xlane.f32.xlu0 %v421_v60 }
 0x161   : > { %v474_v63 = vsel %vm468_vm6, %v463_v62, 0.0 }
 0x162   : > { %v475_v0 = vadd.f32 %v474_v63, %v473_v61 }
 0x164   : > { %476 = vadd.xlane.f32.xlu1 %v475_v0 }
 0x192   : > { %v231_v1 = vpop.xlane.xlu0 %230 }
 0x193   : > { %v232_v2 = vrot.slane %v231_v1, 4 }
 0x195   : > { %v233_v4 = vadd.f32 %v232_v2, %v231_v1 }
 0x196   : > { %v288_v5 = vpop.xlane.xlu0 %287 }
 0x197   : > { %v234_v6 = vrot.slane %v233_v4, 2  ;;  %v289_v7 = vrot.slane %v288_v5, 4 }
 0x199   : > { %v290_v9 = vadd.f32 %v289_v7, %v288_v5  ;;  %v235_v10 = vadd.f32 %v234_v6, %v233_v4 }
 0x19a   : > { %v340_v12 = vpop.xlane.xlu0 %339 }
 0x19b   : > { %v291_v13 = vrot.slane %v290_v9, 2  ;;  %v268_v14 = vpop.xlane.xlu1 %267  ;;  %v341_v15 = vrot.slane %v340_v12, 4  ;;  %v236_v11 = vrot.slane %v235_v10, 1 }
 0x19c   : > { %v269_v16 = vrot.slane %v268_v14, 4 }
 0x19d   : > { %v342_v17 = vadd.f32 %v341_v15, %v340_v12  ;;  %v237_v18 = vadd.f32 %v236_v11, %v235_v10  ;;  %v292_v3 = vadd.f32 %v291_v13, %v290_v9 }
 0x19e   : > { %v270_v8 = vadd.f32 %v269_v16, %v268_v14 }
 0x19f   : > { %v343_v19 = vrot.slane %v342_v17, 2  ;;  %621 = vpush %v237_v18  ;;  %v293_v21 = vrot.slane %v292_v3, 1 }
 0x1a0   : > { %v271_v20 = vrot.slane %v270_v8, 2 }
 0x1a1   : > { %v344_v22 = vadd.f32 %v343_v19, %v342_v17  ;;  %v294_v26 = vadd.f32 %v293_v21, %v292_v3 }
 0x1a2   : > { %v272_v23 = vadd.f32 %v271_v20, %v270_v8 }
 0x1a3   : > { %v345_v24 = vrot.slane %v344_v22, 1 }
 0x1a4   : > { %v273_v25 = vrot.slane %v272_v23, 1 }
 0x1a5   : > { %v346_v28 = vadd.f32 %v345_v24, %v344_v22 }
 0x1a6   : > { %v274_v27 = vadd.f32 %v273_v25, %v272_v23 }
 0x1a8   : > { %623 = vpush %v274_v27 }
 0x1a9   : > { %625 = vpush %v294_v26 }
 0x1aa   : > { %627 = vpush %v346_v28 }
 0x1d0   : > { %s622_s28 = spop %621 }
 0x1d9   : > { %s624_s24 = spop %623 }
 0x1da   : > { %s626_s26 = spop %625 }
 0x1db   : > { %s628_s27 = spop %627  ;;  %s296_s25 = sadd.f32 %s626_s26, %s624_s24 }
 0x1dc   : > { %s348_s7 = smul.f32 0.25, %s628_s27  ;;  %s492_s24 = scalar_lea.sflag [#allocation4], %s999_s16 }
 0x1dd   : > { %s749_s26 = scalar_lea.vmem %s506_s17, 128  ;;  %s828_s27 = smov [#allocation7]  }
 0x1de   : > { %s349_s29 = sadd.f32 %s348_s7, %s296_s25  ;;  %p750_p12 = scmp.ne.s32.totalorder %s506_s17, %s749_s26 }
 0x1df   : > { %s753_s13 = sshll.u32 %s828_s27, 4  ;;  %s754_s13 = int_to_ptr.vmem [resolvable:$false] %s753_s13 }
 0x1e0   : > { %p751_p2 = pnand %p750_p12, %p1150_p0  ;;  %p756_p9 = scmp.lt.s32.totalorder %s506_s17, %s754_s13 }
 0x1e2   : > { %p752_p7 = pneg %p751_p2 }
 0x1e9   : > { %v395_v29 = vpop.xlane.xlu1 %394  ;;  %v423_v30 = vpop.xlane.xlu0 %422 }
 0x1ea   : > { %v396_v31 = vrot.slane %v395_v29, 4  ;;  %v424_v32 = vrot.slane %v423_v30, 4 }
 0x1ec   : > { %v397_v33 = vadd.f32 %v396_v31, %v395_v29  ;;  %v425_v34 = vadd.f32 %v424_v32, %v423_v30 }
 0x1ed   : > { %v477_v35 = vpop.xlane.xlu1 %476 }
 0x1ee   : > { %v398_v36 = vrot.slane %v397_v33, 2  ;;  %v426_v37 = vrot.slane %v425_v34, 2  ;;  %v478_v38 = vrot.slane %v477_v35, 4 }
 0x1f0   : > { %v427_v39 = vadd.f32 %v426_v37, %v425_v34  ;;  %v479_v40 = vadd.f32 %v478_v38, %v477_v35  ;;  %v399_v41 = vadd.f32 %v398_v36, %v397_v33 }
 0x1f2   : > { %v480_v42 = vrot.slane %v479_v40, 2  ;;  %v400_v43 = vrot.slane %v399_v41, 1  ;;  %v428_v44 = vrot.slane %v427_v39, 1 }
 0x1f4   : > { %v481_v45 = vadd.f32 %v480_v42, %v479_v40  ;;  %v401_v46 = vadd.f32 %v400_v43, %v399_v41  ;;  %v429_v47 = vadd.f32 %v428_v44, %v427_v39 }
 0x1f6   : > { %629 = vpush %v401_v46  ;;  %v482_v48 = vrot.slane %v481_v45, 1 }
 0x1f7   : > { %631 = vpush %v429_v47 }
 0x1f8   : > { %v483_v49 = vadd.f32 %v482_v48, %v481_v45 }
 0x1fa   : > { %633 = vpush %v483_v49 }
 0x227   : > { %s630_s23 = spop %629 }
 0x228   : > { %s632_s8 = spop %631 }
 0x229   : > { %s431_s19 = sadd.f32 %s632_s8, %s630_s23  ;;  %s755_s23 = scalar_lea.vmem %s754_s13, 256 }
 0x22a   : > { %p757_p13 = scmp.lt.s32.totalorder %s755_s23, %s749_s26 }
 0x22b   : > { %s634_s4 = spop %633 }
 0x22c   : > { %s485_s3 = smul.f32 0.25, %s634_s4  ;;  %p758_p1 = por %p757_p13, %p756_p9 }
 0x22e   : > { %s486_s5 = sadd.f32 %s485_s3, %s431_s19  ;;  %p759_p3 = pnand %p758_p1, %p752_p7 }
 0x230   : > { %s487_s20 = sadd.f32 %s486_s5, %s349_s29 }
 0x232   : > { %s488_s0 = sadd.f32 %s622_s28, %s487_s20 }
 0x234   : > { %v489_v50 = vstv %s488_s0 }
 0x235   : > { %490 = vst [vmem:[%s203_s14] sm:$0xff] %v489_v50 }
 0x236   : > { %762 = shalt.err (!%p759_p3)
}
 0x237   : > { %s763_s0 = scalar_lea.hbm %s1095_s11, 128  ;;  %s767_s16 = scalar_lea.hbm %s1133_s2, 512 }
 0x238   : > { %p764_p10 = scmp.ne.s32.totalorder %s1095_s11, %s763_s0  ;;  %p768_p5 = scmp.lt.s32.totalorder %s1095_s11, %s1133_s2 }
 0x239   : > { %p769_p8 = scmp.lt.s32.totalorder %s767_s16, %s763_s0 }
 0x23a   : > { %p765_p11 = pnand %p764_p10, %p1150_p0 }
 0x23b   : > { %p770_p6 = por %p769_p8, %p768_p5 }
 0x23c   : > { %p766_p4 = pneg %p765_p11 }
 0x23e   : > { %p771_p12 = pnand %p770_p6, %p766_p4 }
 0x240   : > { %774 = shalt.err (!%p771_p12)
}
 0x241   : > { %639 = dma.vmem_to_hbm [thread:$0]  (%p1150_p0), %s506_s17, 128, %s1095_s11, %s492_s24  }
 0x242 PF: > { %p653_p2 = scmp.ge.s32.totalorder %s817_s12, 2  ;;  %s517_s7 = sand.u32 1, %s805_s9  }
 0x243   : > { %p1151_p7 = scmp.ne.s32.totalorder %s1144_s22, 0  ;;  %s518_s8 = scalar_lea.sflag [#allocation4], %s517_s7 }
 0x245   : > { %p649_p9 = pnand %p653_p2, %p1151_p7 }
 0x247   : > { %p650_p13 = pneg %p649_p9 }
 0x249   : > { %800 = dma.done.wait (%p650_p13), %s518_s8, 128  }
 0x24a   : > { %802 = vsyncadd (%p650_p13), %s518_s8, 4294967168  ;;  %s1152_s30 = sld [smem:[#allocation11_spill]]  ;;  %p18_p1 = scmp.ge.s32.totalorder %s869_s15, 6  }
 0x24b   : > { %s1153_s11 = sld [smem:[#allocation12_spill]]  ;;  %s1154_s9 = smov %s809_s10 }
 0x24c   : > { %s1156_s12 = smov %s869_s15  ;;  %20 = sbr.rel (!%p18_p1) target bundleno = 10 (0xa), region = 86 }
 0x250   : > { %s1155_s10 = smov %s1152_s30 }
 0x251   :  { %523 = vsyncpa [#allocation3], 1 }
 0x252   :  { %525 = vsyncpa [#allocation3 + $0x1], 1 }
 0x253   :  { %526 = vsyncpa [#allocation6], 1 }
 0x254   :  { %528 = vsyncpa [#allocation6 + $0x1], 1 }
 0x255   :  { %529 = vsyncpa [#allocation4], 1 }
 0x256   :  { %531 = vsyncpa [#allocation4 + $0x1], 1 }

</bundles_post_ra>
